<compile_context>
chip_gen: v7x
topology: tpu7x:2x2x1
jax: 0.10.0
libtpu: 0.0.40
codegen_flags: <defaults>
</compile_context>

<pallas_src>
import math

import jax
import jax.numpy as jnp
from jax.experimental import pallas as pl
from jax.experimental.pallas import tpu as pltpu


_LANE_GRANULE = 256  # MXU granule on v6e/v7x; also a multiple of v5e's 128.


def _round_up(x: int, m: int) -> int:
    return ((x + m - 1) // m) * m


def _vmem_capacity_bytes() -> int:
    try:
        return int(pltpu.get_tpu_info().vmem_capacity_bytes)
    except Exception:  # conservative default = v7x per-TC VMEM
        return 64 * 2**20


# ---------------------------------------------------------------------------
# Kernels
# ---------------------------------------------------------------------------
def _fc_tanh_direct_kernel(x_ref, w_ref, b_ref, o_ref):
    """K fits one tile: y_tile = tanh(x_tile @ w_tile + b_row), no scratch."""
    acc = jnp.dot(x_ref[...], w_ref[...], preferred_element_type=jnp.float32)
    o_ref[...] = jnp.tanh(acc + b_ref[...]).astype(o_ref.dtype)


def _fc_tanh_acc_kernel(x_ref, w_ref, b_ref, o_ref, acc_ref):
    """Multi-K tiles: f32 VMEM accumulator, bias folded into the k==0 init."""
    k = pl.program_id(2)
    partial = jnp.dot(x_ref[...], w_ref[...], preferred_element_type=jnp.float32)

    @pl.when(k == 0)
    def _init():
        acc_ref[...] = partial + b_ref[...]      # no zero-fill pass

    @pl.when(k != 0)
    def _accumulate():
        acc_ref[...] += partial

    @pl.when(k == pl.num_programs(2) - 1)
    def _finalize():
        o_ref[...] = jnp.tanh(acc_ref[...]).astype(o_ref.dtype)


# ---------------------------------------------------------------------------
# Tile selection
# ---------------------------------------------------------------------------
def _choose_tiles(B, IN, OUT, in_itemsize, out_itemsize, budget,
                  block_m, block_n, block_k):
    gm = max(8, 32 // in_itemsize)   # sublane granule: 8 (f32) / 16 (bf16) / 32
    lane = _LANE_GRANULE

    # M: cover B in as few blocks as possible (weight streams once per M block).
    if block_m is not None:
        tm = min(_round_up(block_m, gm), _round_up(B, gm))
    elif B <= 512:
        tm = B
    else:
        tm = 512                                   # multiple of 8/16/32

    # K: prefer a single K block -> direct kernel, no accumulator scratch.
    if block_k is not None:
        tk = min(_round_up(block_k, lane), _round_up(IN, lane))
    elif IN <= 2048:
        tk = IN
    else:
        tk = 2048

    # N.
    if block_n is not None:
        tn = min(_round_up(block_n, lane), _round_up(OUT, lane))
    elif OUT <= 2048:
        tn = OUT
    else:
        tn = 2048

    # Give megacore (v7x: 2 TCs) at least two parallel blocks on small layers.
    if (block_n is None and pl.cdiv(B, tm) == 1 and pl.cdiv(OUT, tn) == 1
            and OUT >= 2 * lane):
        tn = _round_up(pl.cdiv(OUT, 2), lane)

    # Full-dim blocks whenever the tile covers the whole axis (no padding and
    # no (8,128) alignment requirement on full-dim blocks).
    tm = B if tm >= B else tm
    tk = IN if tk >= IN else tk
    tn = OUT if tn >= OUT else tn

    def footprint(tm_, tn_, tk_):
        multi_k = tk_ < IN
        return (2 * (tm_ * tk_ + tk_ * tn_) * in_itemsize   # double-buffered operands
                + 2 * tn_ * 4                               # bias row
                + 2 * tm_ * tn_ * out_itemsize              # output tile
                + (tm_ * tn_ * 4 if multi_k else 0))        # f32 accumulator

    # Shrink (largest dim first) until the double-buffered footprint fits.
    while footprint(tm, tn, tk) > budget:
        if tk >= max(tm, tn) and tk > lane:
            tk = max(lane, _round_up(tk // 2, lane) if tk // 2 > lane else lane)
        elif tn >= tm and tn > lane:
            tn = max(lane, _round_up(tn // 2, lane) if tn // 2 > lane else lane)
        elif tm > gm:
            tm = max(gm, _round_up(tm // 2, gm))
        else:
            break
    return tm, tn, tk


# ---------------------------------------------------------------------------
# Forward pass wrapper
# ---------------------------------------------------------------------------
def fully_connected_tanh(x, w_io, bias, *, compute_dtype=jnp.bfloat16,
                         block_m=None, block_n=None, block_k=None):
    """y = tanh(x @ w_io + bias).

    x:    (B, IN)
    w_io: (IN, OUT)   -- nn.Linear weight stored pre-transposed
    bias: (OUT,)
    compute_dtype: MXU operand dtype (default bf16); accumulation, bias add and
                   tanh always run in f32 and the output keeps x.dtype.
    block_m/n/k: optional explicit tile sizes (auto-chosen from VMEM otherwise).
    """
    B, IN = x.shape
    in_w, OUT = w_io.shape
    assert in_w == IN and bias.shape == (OUT,)
    out_dtype = x.dtype

    if compute_dtype is None:
        compute_dtype = x.dtype
    compute_dtype = jnp.dtype(compute_dtype)
    in_itemsize = compute_dtype.itemsize
    out_itemsize = jnp.dtype(out_dtype).itemsize

    vmem_cap = _vmem_capacity_bytes()
    budget = (3 * vmem_cap) // 4          # ~96 MiB on v5e/v6e, ~48 MiB on v7x

    tm, tn, tk = _choose_tiles(B, IN, OUT, in_itemsize, out_itemsize, budget,
                               block_m, block_n, block_k)

    # K must be an exact tile multiple when it spans several tiles (zero pad is
    # benign for the dot).  M/N ragged edges use partial blocks - no padding.
    k_total = IN
    if tk < IN and IN % tk != 0:
        k_total = _round_up(IN, tk)
        # TODO(synk): for traced weights (training), hoist this pad out of the
        # per-step function so it is paid once rather than per call.
        x = jnp.pad(x, ((0, 0), (0, k_total - IN)))
        w_io = jnp.pad(w_io, ((0, k_total - IN), (0, 0)))

    if x.dtype != compute_dtype:
        x = x.astype(compute_dtype)
    if w_io.dtype != compute_dtype:
        w_io = w_io.astype(compute_dtype)
    bias2d = bias.reshape(1, OUT).astype(jnp.float32)

    grid_m = pl.cdiv(B, tm)
    grid_n = pl.cdiv(OUT, tn)
    grid_k = pl.cdiv(k_total, tk)

    cost = pl.CostEstimate(
        flops=2 * B * OUT * k_total,
        transcendentals=B * OUT,
        bytes_accessed=(grid_n * B * k_total * in_itemsize      # x re-read per N block
                        + grid_m * k_total * OUT * in_itemsize  # W re-read per M block
                        + B * OUT * out_itemsize                # output written once
                        + grid_m * grid_k * OUT * 4),           # bias rows
    )

    if grid_k == 1:
        kernel = _fc_tanh_direct_kernel
        grid = (grid_m, grid_n)
        in_specs = [
            pl.BlockSpec((tm, tk), lambda i, j: (i, 0)),   # x tile
            pl.BlockSpec((tk, tn), lambda i, j: (0, j)),   # weight tile
            pl.BlockSpec((1, tn), lambda i, j: (0, j)),    # bias row
        ]
        out_specs = pl.BlockSpec((tm, tn), lambda i, j: (i, j))
        scratch_shapes = []
        semantics = ("parallel", "parallel")
    else:
        kernel = _fc_tanh_acc_kernel
        grid = (grid_m, grid_n, grid_k)
        in_specs = [
            pl.BlockSpec((tm, tk), lambda i, j, k: (i, k)),   # x tile
            pl.BlockSpec((tk, tn), lambda i, j, k: (k, j)),   # weight tile
            pl.BlockSpec((1, tn), lambda i, j, k: (0, j)),    # bias row
        ]
        out_specs = pl.BlockSpec((tm, tn), lambda i, j, k: (i, j))
        scratch_shapes = [pltpu.VMEM((tm, tn), jnp.float32)]
        semantics = ("parallel", "parallel", "arbitrary")

    return pl.pallas_call(
        kernel,
        out_shape=jax.ShapeDtypeStruct((B, OUT), out_dtype),
        grid_spec=pltpu.PrefetchScalarGridSpec(
            num_scalar_prefetch=0,
            grid=grid,
            in_specs=in_specs,
            out_specs=out_specs,
            scratch_shapes=scratch_shapes,
        ),
        compiler_params=pltpu.CompilerParams(
            dimension_semantics=semantics,
            vmem_limit_bytes=int(budget),
        ),
        cost_estimate=cost,
    )(x, w_io, bias2d)


def init_params(key, input_size, output_size):
    """Matches the PyTorch module: kaiming_uniform_(weight, nonlinearity='relu'),
    zero bias.  The weight is returned pre-transposed as (IN, OUT) so the
    forward pass never pays a per-call HBM transpose."""
    gain = math.sqrt(2.0)                        # relu gain
    bound = gain * math.sqrt(3.0 / input_size)   # fan_in = input_size
    w_oi = jax.random.uniform(key, (output_size, input_size),
                              dtype=jnp.float32, minval=-bound, maxval=bound)
    bias = jnp.zeros((output_size,), dtype=jnp.float32)
    return w_oi.T, bias                          # one-time transpose at init


if __name__ == "__main__":
    key = jax.random.PRNGKey(0)
    k_x, k_w = jax.random.split(key)

    # Shapes consistent with the module's forward: x is (batch, input_size).
    batch, input_size, output_size = 8, 32, 16
    x = jax.random.normal(k_x, (batch, input_size), dtype=jnp.float32)
    w_io, bias = init_params(k_w, input_size, output_size)
    ref = jnp.tanh(jnp.dot(x, w_io, precision=jax.lax.Precision.HIGHEST) + bias)

    # Default path: bf16 MXU operands, f32 accumulation / epilogue.
    out = jax.block_until_ready(fully_connected_tanh(x, w_io, bias))
    assert out.shape == (batch, output_size) and out.dtype == x.dtype
    assert jnp.allclose(out, ref, atol=3e-2, rtol=3e-2)

    # Full-f32 operand path.
    out_f32 = jax.block_until_ready(
        fully_connected_tanh(x, w_io, bias, compute_dtype=jnp.float32))
    assert jnp.allclose(out_f32, ref, atol=1e-4, rtol=1e-4)

    # Multi-tile path: grid (2, 2, 2) -> K-axis accumulation with the bias
    # folded into the k==0 init, a ragged M edge (72 rows over 64-row tiles)
    # and a partial final N block.  No jnp.pad anywhere on this path.
    k_x2, k_w2, k_b2 = jax.random.split(jax.random.PRNGKey(1), 3)
    bsz2, insz2, outsz2 = 72, 512, 384
    x2 = jax.random.normal(k_x2, (bsz2, insz2), dtype=jnp.float32)
    w2, _ = init_params(k_w2, insz2, outsz2)
    bias2 = 0.1 * jax.random.normal(k_b2, (outsz2,), dtype=jnp.float32)
    ref2 = jnp.tanh(jnp.dot(x2, w2, precision=jax.lax.Precision.HIGHEST) + bias2)

    y2 = jax.block_until_ready(
        fully_connected_tanh(x2, w2, bias2, compute_dtype=jnp.float32,
                             block_m=64, block_n=256, block_k=256))
    assert y2.shape == (bsz2, outsz2)
    assert jnp.allclose(y2, ref2, atol=5e-3, rtol=5e-3)

    y2_bf16 = jax.block_until_ready(
        fully_connected_tanh(x2, w2, bias2,
                             block_m=64, block_n=256, block_k=256))
    assert jnp.allclose(y2_bf16, ref2, atol=3e-2, rtol=3e-2)

    print("KERNEL_OK")
</pallas_src>

<mosaic_0001>
module attributes {stable_mosaic.version = 11 : i64} {
  func.func @_fc_tanh_direct_kernel(%arg0: i32, %arg1: i32, %arg2: memref<8x32xbf16, #tpu.memory_space<vmem>>, %arg3: memref<32x16xbf16, #tpu.memory_space<vmem>>, %arg4: memref<1x16xf32, #tpu.memory_space<vmem>>, %arg5: memref<8x16xf32, #tpu.memory_space<vmem>>) attributes {dimension_semantics = [#tpu.dimension_semantics<parallel>, #tpu.dimension_semantics<parallel>], iteration_bounds = array<i64: 1, 1>, scalar_prefetch = 0 : i64, scratch_operands = 0 : i64, tpu.core_type = #tpu.core_type<tc>, window_params = [{transform_indices = @transform_0, window_bounds = array<i64: 8, 32>}, {transform_indices = @transform_1, window_bounds = array<i64: 32, 16>}, {transform_indices = @transform_2, window_bounds = array<i64: 1, 16>}, {transform_indices = @transform_3, window_bounds = array<i64: 8, 16>}]} {
    %c0 = arith.constant 0 : index
    %c0_0 = arith.constant 0 : index
    %0 = vector.load %arg2[%c0, %c0_0] : memref<8x32xbf16, #tpu.memory_space<vmem>>, vector<8x32xbf16>
    %c0_1 = arith.constant 0 : index
    %c0_2 = arith.constant 0 : index
    %1 = vector.load %arg3[%c0_1, %c0_2] : memref<32x16xbf16, #tpu.memory_space<vmem>>, vector<32x16xbf16>
    %cst = arith.constant dense<0.000000e+00> : vector<8x16xf32>
    %2 = tpu.matmul %0, %1, %cst {dimension_numbers = #tpu.dot_dimension_numbers<[1], [0], [0], [1], [0, 0, 1, 1], [], []>} : vector<8x32xbf16>, vector<32x16xbf16>, vector<8x16xf32> -> vector<8x16xf32>
    %c0_3 = arith.constant 0 : index
    %c0_4 = arith.constant 0 : index
    %3 = vector.load %arg4[%c0_3, %c0_4] : memref<1x16xf32, #tpu.memory_space<vmem>>, vector<1x16xf32>
    %4 = vector.broadcast %3 : vector<1x16xf32> to vector<8x16xf32>
    %5 = arith.addf %2, %4 : vector<8x16xf32>
    %6 = math.tanh %5 : vector<8x16xf32>
    %c0_5 = arith.constant 0 : index
    %c0_6 = arith.constant 0 : index
    %7 = vector.load %arg5[%c0_5, %c0_6] : memref<8x16xf32, #tpu.memory_space<vmem>>, vector<8x16xf32>
    tpu.vector_store %arg5[%c0_5, %c0_6], %6 {strides = array<i32>} : memref<8x16xf32, #tpu.memory_space<vmem>>, vector<8x16xf32>,
    return
  }
  func.func @transform_0(%arg0: i32, %arg1: i32) -> (i32, i32) {
    %c0_i32 = arith.constant 0 : i32
    %c0_i32_0 = arith.constant 0 : i32
    return %arg0, %c0_i32 : i32, i32
  }
  func.func @transform_1(%arg0: i32, %arg1: i32) -> (i32, i32) {
    %c0_i32 = arith.constant 0 : i32
    %c0_i32_0 = arith.constant 0 : i32
    return %c0_i32, %arg1 : i32, i32
  }
  func.func @transform_2(%arg0: i32, %arg1: i32) -> (i32, i32) {
    %c0_i32 = arith.constant 0 : i32
    %c0_i32_0 = arith.constant 0 : i32
    return %c0_i32, %arg1 : i32, i32
  }
  func.func @transform_3(%arg0: i32, %arg1: i32) -> (i32, i32) {
    %c0_i32 = arith.constant 0 : i32
    return %arg0, %arg1 : i32, i32
  }
}

</mosaic_0001>

<bundles_post_ra>
// kernel: tpu_custom_call.1
= control target key start
LH: loop header
LB: loop body
LE: loop exit
PB: predicated region body
PF: predicated region fallthrough
CT: control target
= control target key end

     0   :  { %v147_v1 = vmov 0.0   ;;  %vm148_vm0 = vmmov 0   ;;  %s194_s0 = inlined_call_operand.vmem [shape: bf16[8,32], index: 0, kind: input, shape index: {}]   ;;  %s195_s1 = inlined_call_operand.vmem [shape: bf16[32,16], index: 1, kind: input, shape index: {}]   ;;  %s196_s2 = inlined_call_operand.vmem [shape: f32[1,16], index: 2, kind: input, shape index: {}]   ;;  %s197_s3 = inlined_call_operand.hbm [shape: f32[8,16], index: 3, kind: output, shape index: {}]  }
   0x1   :  { %v119_v0 = vld [vmem:[%s195_s1] sm:$0xff]   ;;  %108 = vmatprep.subr.bf16.mxu0 %v147_v1  ;;  %v120_v2 = vld [vmem:[%s195_s1 + $0x8] sm:$0xff]   ;;  %112 = vmatprep.mubr.msk.bf16.mxu0 %vm148_vm0, %v147_v1 }
   0x2   :  { %109 = vmatpush3.bf16.msra.mxu0 %v119_v0 }
   0x3   :  { %110 = vmatprep.subr.bf16.mxu0 %v147_v1 }
   0x4   :  { %8 = vsyncpa [#allocation3], 0  ;;  %v16_v3 = vld [vmem:[%s194_s0] sm:$0xf]  ;;  %vm40_vm1 = vcmask 261120   ;;  %s149_s1 = smov [#allocation2]  }
   0x5   :  { %v101_v4 = vld [vmem:[%s196_s2] ss:$0 sm:$0xff]  ;;  %s93_s20 = sshll.u32 %s149_s1, 4  ;;  %vm85_vm2 = vcmask 130048   ;;  %s94_s20 = int_to_ptr.vmem [resolvable:$true] %s93_s20 }
   0x6   :  { %111 = vmatpush3.bf16.msra.mxu0 %v120_v2  ;;  %s123_s21 = scalar_lea.vmem %s94_s20, 128  ;;  %p128_p1 = scmp.lt.s32.totalorder %s94_s20, %s94_s20 }
   0x7   :  { %p124_p0 = scmp.ne.s32.totalorder %s94_s20, %s123_s21  ;;  %p129_p2 = scmp.lt.s32.totalorder %s123_s21, %s123_s21 }
   0x9   :  { %113 = vmatmul.mubr.msk.bf16.vlgmr.msra.gmra.mrb[0].mxu0 %vm40_vm1, %v16_v3  ;;  %p130_p3 = por %p129_p2, %p128_p1 }
   0xb   :  { %p131_p4 = pnand %p130_p3, %p124_p0 }
  0xdc   :  { %v78_v5 = vpop.f32.mrb[0].mxu0 }
  0xdd   :  { %v79_v6 = vadd.f32 %v101_v4, %v78_v5  ;;  %v114_v7 = vpop.f32.mrb[1].mxu0 }
  0xde   :  { %v81_v8 = vpop.f32.mrb[2].mxu0 }
  0xdf   :  { %121 = vtanh.f32 %v79_v6  ;;  %v115_v9 = vpop.f32.mrb[3].mxu0 }
  0xe9   :  { %v122_v10 = vpop.eup %121 }
  0xea   :  { %86 = vst.msk [vmem:[#allocation2] sm:$0xff] %vm85_vm2, %v122_v10 }
  0xeb   :  { %134 = shalt.err (!%p131_p4)
}
  0xec   :  { %s135_s22 = scalar_lea.hbm %s197_s3, 128 }
  0xed   :  { %p136_p5 = scmp.ne.s32.totalorder %s197_s3, %s135_s22  ;;  %p139_p6 = scmp.lt.u32.totalorder %s135_s22, %s197_s3 }
  0xef   :  { %p141_p7 = pnand %p139_p6, %p136_p5 }
  0xf1   :  { %144 = shalt.err (!%p141_p7)
}
  0xf2   :  { %96 = dma.vmem_to_hbm [thread:$0]  %s94_s20, 128, %s197_s3, [#allocation3]  }
  0xf3   :  { %145 = dma.done.wait [#allocation3], 128  }
  0xf4   :  { %146 = vsyncadd [#allocation3], 4294967168 }
  0xf5   :  { %100 = vsyncpa [#allocation3], 1 }

</bundles_post_ra>
